<compile_context>
chip_gen: v5e
topology: v5e:2x2
jax: 0.10.0
libtpu: 0.0.40
codegen_flags: <defaults>
</compile_context>

<pallas_src>
import jax
import jax.numpy as jnp
from jax.experimental import pallas as pl
from jax.experimental.pallas import tpu as pltpu


def _round_up(x, m):
    return ((x + m - 1) // m) * m


# ---------------------------------------------------------------------------
# Pallas kernel: gather -> (concat) -> Linear+ReLU x2 -> decoder -> sigmoid
# ---------------------------------------------------------------------------
def mlp_kernel(uid_ref, iid_ref, tbl_ref, w1_ref, w2_ref, col_ref, bd_ref,
               out_ref):
    """All activations are (features, batch): batch on the lane (fast) axis."""
    vc = tbl_ref.shape[1]          # padded combined vocab (user cols + item cols)
    h1_dim = w1_ref.shape[0]
    h2_dim = w2_ref.shape[0]
    bm = uid_ref.shape[1]

    # Fused embedding gather + concat: each one-hot column has a 1 at the user
    # column and a 1 at the (pre-offset) item column; matmul against the
    # block-diagonal combined table gives x = [user_emb; item_emb]  (2E, bm).
    iota = jax.lax.broadcasted_iota(jnp.int32, (vc, bm), 0)
    onehot = jnp.where(
        jnp.logical_or(iota == uid_ref[...], iota == iid_ref[...]), 1.0, 0.0)
    x = jnp.dot(tbl_ref[...], onehot, preferred_element_type=jnp.float32)

    col = col_ref[...]                              # packed [b1; b2; wd^T]
    b1 = col[:h1_dim]                               # (H1, 1)
    b2 = col[h1_dim:h1_dim + h2_dim]                # (H2, 1)
    wd = col[h1_dim + h2_dim:]                      # (H2, 1)

    # fc layer 0 + ReLU, fc layer 1 + ReLU (f32 end to end, f32 MXU accum).
    h1 = jnp.maximum(
        jnp.dot(w1_ref[...], x, preferred_element_type=jnp.float32) + b1, 0.0)
    h2 = jnp.maximum(
        jnp.dot(w2_ref[...], h1, preferred_element_type=jnp.float32) + b2, 0.0)

    # Decoder Linear(H2, 1) on VPU/XLU (broadcast-mul + sublane reduce) instead
    # of an M=1 MXU pass, then sigmoid; output stays a lane-dense (1, bm) row.
    logits = jnp.sum(h2 * wd, axis=0, keepdims=True) + bd_ref[0, 0]
    out_ref[...] = jax.nn.sigmoid(logits)


def mlp_forward_pallas(users, items_off, table_c, w1, w2, col, bd, *,
                       max_bm=8192):
    """users/items_off: (B,) int32 (item ids already offset into the combined
    table's column space).  Returns (B, 1) f32 ratings."""
    B = users.shape[0]
    TE, VC = table_c.shape         # (2E, padded combined vocab)
    H1 = w1.shape[0]
    H2 = w2.shape[0]

    # One lane-dense batch tile; single grid step unless B exceeds max_bm
    # (VMEM is never the binding constraint at these feature sizes).
    bm = max(128, _round_up(min(max_bm, max(B, 1)), 128))
    B_pad = _round_up(B, bm)
    num_tiles = B_pad // bm

    pad = (0, B_pad - B)
    uid = jnp.pad(users.astype(jnp.int32), pad)[None, :]       # (1, B_pad)
    iid = jnp.pad(items_off.astype(jnp.int32), pad)[None, :]   # (1, B_pad)

    out = pl.pallas_call(
        mlp_kernel,
        out_shape=jax.ShapeDtypeStruct((1, B_pad), jnp.float32),
        grid=(num_tiles,),
        in_specs=[
            pl.BlockSpec((1, bm), lambda i: (0, i)),          # user ids
            pl.BlockSpec((1, bm), lambda i: (0, i)),          # item ids (offset)
            pl.BlockSpec((TE, VC), lambda i: (0, 0)),         # combined table
            pl.BlockSpec((H1, TE), lambda i: (0, 0)),         # W1 (fc0)
            pl.BlockSpec((H2, H1), lambda i: (0, 0)),         # W2 (fc1)
            pl.BlockSpec((H1 + 2 * H2, 1), lambda i: (0, 0)), # [b1; b2; wd^T]
            pl.BlockSpec(memory_space=pltpu.MemorySpace.SMEM),  # bd scalar
        ],
        out_specs=pl.BlockSpec((1, bm), lambda i: (0, i)),    # lane-dense row
        compiler_params=pltpu.CompilerParams(
            dimension_semantics=("parallel",)),
    )(uid, iid, table_c, w1, w2, col, bd)

    return out[0, :B][:, None]


# ---------------------------------------------------------------------------
# Full MLPnet forward on packed params (everything fused into the kernel)
# ---------------------------------------------------------------------------
def mlpnet_forward(packed, users, items, *, max_bm=8192):
    items_off = items.astype(jnp.int32) + packed["item_offset"]
    return mlp_forward_pallas(
        users, items_off, packed["table_c"],
        packed["w1"], packed["w2"], packed["col"], packed["bd"],
        max_bm=max_bm)


def mlpnet_forward_ref(params, users, items):
    """Pure-JAX f32 reference matching the PyTorch semantics."""
    hi = jax.lax.Precision.HIGHEST
    u = params["user_table"][users]                       # (B, E)
    it = params["item_table"][items]                      # (B, E)
    x = jnp.concatenate([u, it], axis=-1)                 # (B, 2E)
    h1 = jnp.maximum(jnp.matmul(x, params["w1"].T, precision=hi)
                     + params["b1"], 0.0)
    h2 = jnp.maximum(jnp.matmul(h1, params["w2"].T, precision=hi)
                     + params["b2"], 0.0)
    logits = jnp.matmul(h2, params["wd"].T, precision=hi) + params["bd"]
    return jax.nn.sigmoid(logits)                         # (B, 1)


# ---------------------------------------------------------------------------
# Parameter init (PyTorch layout) and kernel-side packing
# ---------------------------------------------------------------------------
def init_params(key, user_size, item_size, embedding_size, layers):
    # Specialized to the 2-fc-layer config: layers = [2E, H1, H2], decoder
    # Linear(H2 == embedding_size, 1), matching the reference module.
    assert len(layers) == 3
    assert layers[0] == 2 * embedding_size
    assert layers[-1] == embedding_size
    E, H1, H2 = embedding_size, layers[1], layers[2]
    ks = jax.random.split(key, 8)

    def linear(kw, kb, fan_in, fan_out):
        bound = 1.0 / (fan_in ** 0.5)
        w = jax.random.uniform(kw, (fan_out, fan_in), jnp.float32, -bound, bound)
        b = jax.random.uniform(kb, (fan_out,), jnp.float32, -bound, bound)
        return w, b

    w1, b1 = linear(ks[2], ks[3], 2 * E, H1)   # (H1, 2E), (H1,)
    w2, b2 = linear(ks[4], ks[5], H1, H2)      # (H2, H1), (H2,)
    wd, bd = linear(ks[6], ks[7], H2, 1)       # (1, H2),  (1,)

    return {
        "user_table": jax.random.normal(ks[0], (user_size, E), jnp.float32),
        "item_table": jax.random.normal(ks[1], (item_size, E), jnp.float32),
        "w1": w1, "b1": b1, "w2": w2, "b2": b2, "wd": wd, "bd": bd,
    }


def pack_params(params):
    """Build the kernel-side constants: block-diagonal combined transposed
    embedding table, packed bias/decoder column, SMEM scalar bias."""
    vu, E = params["user_table"].shape
    vi, _ = params["item_table"].shape
    vc = _round_up(vu + vi, 8)
    tbl = jnp.zeros((2 * E, vc), jnp.float32)
    tbl = tbl.at[:E, :vu].set(params["user_table"].T)
    tbl = tbl.at[E:, vu:vu + vi].set(params["item_table"].T)
    col = jnp.concatenate(
        [params["b1"][:, None], params["b2"][:, None], params["wd"].T], axis=0)
    return {
        "table_c": tbl,                                   # (2E, vc)
        "item_offset": jnp.int32(vu),                     # item column offset
        "w1": params["w1"], "w2": params["w2"],
        "col": col,                                       # (H1 + 2*H2, 1)
        "bd": params["bd"].reshape(1, 1),                 # SMEM scalar
    }


if __name__ == "__main__":
    user_size, item_size = 10, 20
    embedding_size = 16
    layers = [32, 32, 16]      # layers[0] = 2*E, layers[-1] = E (decoder input)
    B = 200                    # exercises the lane-padding (200 -> 256) path

    key = jax.random.PRNGKey(0)
    kp, ku, ki = jax.random.split(key, 3)
    params = init_params(kp, user_size, item_size, embedding_size, layers)
    packed = pack_params(params)

    users = jax.random.randint(ku, (B,), 0, user_size, dtype=jnp.int32)
    items = jax.random.randint(ki, (B,), 0, item_size, dtype=jnp.int32)

    fwd = jax.jit(mlpnet_forward)
    rating = jax.block_until_ready(fwd(packed, users, items))
    ref = mlpnet_forward_ref(params, users, items)

    assert rating.shape == (B, 1)
    err = float(jnp.max(jnp.abs(rating - ref)))
    # Both paths are f32; tolerance leaves headroom for MXU pass decomposition.
    assert err < 5e-3, f"max abs err {err}"

    print("KERNEL_OK")
</pallas_src>

<mosaic_0001>
module attributes {stable_mosaic.version = 11 : i64} {
  func.func @mlp_kernel(%arg0: i32, %arg1: memref<1x256xi32, #tpu.memory_space<vmem>>, %arg2: memref<1x256xi32, #tpu.memory_space<vmem>>, %arg3: memref<32x32xf32, #tpu.memory_space<vmem>>, %arg4: memref<32x32xf32, #tpu.memory_space<vmem>>, %arg5: memref<16x32xf32, #tpu.memory_space<vmem>>, %arg6: memref<64x1xf32, #tpu.memory_space<vmem>>, %arg7: memref<1x1xf32, #tpu.memory_space<smem>>, %arg8: memref<1x256xf32, #tpu.memory_space<vmem>>) attributes {dimension_semantics = [#tpu.dimension_semantics<parallel>], iteration_bounds = array<i64: 1>, scalar_prefetch = 0 : i64, scratch_operands = 0 : i64, tpu.core_type = #tpu.core_type<tc>, window_params = [{transform_indices = @transform_0, window_bounds = array<i64: 1, 256>}, {transform_indices = @transform_1, window_bounds = array<i64: 1, 256>}, {pipeline_mode = #tpu.pipeline_mode<synchronous>, transform_indices = @transform_2, window_bounds = array<i64: 32, 32>}, {pipeline_mode = #tpu.pipeline_mode<synchronous>, transform_indices = @transform_3, window_bounds = array<i64: 32, 32>}, {pipeline_mode = #tpu.pipeline_mode<synchronous>, transform_indices = @transform_4, window_bounds = array<i64: 16, 32>}, {pipeline_mode = #tpu.pipeline_mode<synchronous>, transform_indices = @transform_5, window_bounds = array<i64: 64, 1>}, {transform_indices = @transform_6, window_bounds = array<i64: 1, 1>}, {transform_indices = @transform_7, window_bounds = array<i64: 1, 256>}]} {
    %0 = tpu.iota {dimensions = array<i32: 0>} : vector<32x256xi32>
    %c0 = arith.constant 0 : index
    %c0_0 = arith.constant 0 : index
    %1 = vector.load %arg1[%c0, %c0_0] : memref<1x256xi32, #tpu.memory_space<vmem>>, vector<1x256xi32>
    %2 = vector.broadcast %1 : vector<1x256xi32> to vector<32x256xi32>
    %3 = arith.cmpi eq, %0, %2 : vector<32x256xi32>
    %c0_1 = arith.constant 0 : index
    %c0_2 = arith.constant 0 : index
    %4 = vector.load %arg2[%c0_1, %c0_2] : memref<1x256xi32, #tpu.memory_space<vmem>>, vector<1x256xi32>
    %5 = vector.broadcast %4 : vector<1x256xi32> to vector<32x256xi32>
    %6 = arith.cmpi eq, %0, %5 : vector<32x256xi32>
    %7 = arith.ori %3, %6 : vector<32x256xi1>
    %cst = arith.constant 1.000000e+00 : f32
    %cst_3 = arith.constant 0.000000e+00 : f32
    %8 = vector.broadcast %cst : f32 to vector<32x256xf32>
    %9 = vector.broadcast %cst_3 : f32 to vector<32x256xf32>
    %10 = arith.select %7, %8, %9 : vector<32x256xi1>, vector<32x256xf32>
    %c0_4 = arith.constant 0 : index
    %c0_5 = arith.constant 0 : index
    %11 = vector.load %arg3[%c0_4, %c0_5] : memref<32x32xf32, #tpu.memory_space<vmem>>, vector<32x32xf32>
    %cst_6 = arith.constant dense<0.000000e+00> : vector<32x256xf32>
    %12 = tpu.matmul %11, %10, %cst_6 {dimension_numbers = #tpu.dot_dimension_numbers<[1], [0], [0], [1], [0, 0, 1, 1], [], []>} : vector<32x32xf32>, vector<32x256xf32>, vector<32x256xf32> -> vector<32x256xf32>
    %c0_7 = arith.constant 0 : index
    %c0_8 = arith.constant 0 : index
    %13 = vector.load %arg6[%c0_7, %c0_8] : memref<64x1xf32, #tpu.memory_space<vmem>>, vector<64x1xf32>
    %14 = vector.extract_strided_slice %13 {offsets = [0, 0], sizes = [32, 1], strides = [1, 1]} : vector<64x1xf32> to vector<32x1xf32>
    %15 = vector.extract_strided_slice %13 {offsets = [32, 0], sizes = [16, 1], strides = [1, 1]} : vector<64x1xf32> to vector<16x1xf32>
    %16 = vector.extract_strided_slice %13 {offsets = [48, 0], sizes = [16, 1], strides = [1, 1]} : vector<64x1xf32> to vector<16x1xf32>
    %c0_9 = arith.constant 0 : index
    %c0_10 = arith.constant 0 : index
    %17 = vector.load %arg4[%c0_9, %c0_10] : memref<32x32xf32, #tpu.memory_space<vmem>>, vector<32x32xf32>
    %cst_11 = arith.constant dense<0.000000e+00> : vector<32x256xf32>
    %18 = tpu.matmul %17, %12, %cst_11 {dimension_numbers = #tpu.dot_dimension_numbers<[1], [0], [0], [1], [0, 0, 1, 1], [], []>} : vector<32x32xf32>, vector<32x256xf32>, vector<32x256xf32> -> vector<32x256xf32>
    %19 = vector.broadcast %14 : vector<32x1xf32> to vector<32x256xf32>
    %20 = arith.addf %18, %19 : vector<32x256xf32>
    %cst_12 = arith.constant 0.000000e+00 : f32
    %21 = vector.broadcast %cst_12 : f32 to vector<32x256xf32>
    %22 = arith.maximumf %20, %21 : vector<32x256xf32>
    %c0_13 = arith.constant 0 : index
    %c0_14 = arith.constant 0 : index
    %23 = vector.load %arg5[%c0_13, %c0_14] : memref<16x32xf32, #tpu.memory_space<vmem>>, vector<16x32xf32>
    %cst_15 = arith.constant dense<0.000000e+00> : vector<16x256xf32>
    %24 = tpu.matmul %23, %22, %cst_15 {dimension_numbers = #tpu.dot_dimension_numbers<[1], [0], [0], [1], [0, 0, 1, 1], [], []>} : vector<16x32xf32>, vector<32x256xf32>, vector<16x256xf32> -> vector<16x256xf32>
    %25 = vector.broadcast %15 : vector<16x1xf32> to vector<16x256xf32>
    %26 = arith.addf %24, %25 : vector<16x256xf32>
    %cst_16 = arith.constant 0.000000e+00 : f32
    %27 = vector.broadcast %cst_16 : f32 to vector<16x256xf32>
    %28 = arith.maximumf %26, %27 : vector<16x256xf32>
    %29 = vector.broadcast %16 : vector<16x1xf32> to vector<16x256xf32>
    %30 = arith.mulf %28, %29 : vector<16x256xf32>
    %cst_17 = arith.constant dense<0.000000e+00> : vector<256xf32>
    %31 = vector.multi_reduction <add>, %30, %cst_17 [0] : vector<16x256xf32> to vector<256xf32>
    %32 = vector.shape_cast %31 : vector<256xf32> to vector<1x256xf32>
    %c0_18 = arith.constant 0 : index
    %c0_19 = arith.constant 0 : index
    %33 = memref.load %arg7[%c0_18, %c0_19] : memref<1x1xf32, #tpu.memory_space<smem>>
    %34 = vector.broadcast %33 : f32 to vector<1x256xf32>
    %35 = arith.addf %32, %34 : vector<1x256xf32>
    %36 = arith.negf %35 : vector<1x256xf32>
    %37 = math.exp %36 : vector<1x256xf32>
    %cst_20 = arith.constant 1.000000e+00 : f32
    %38 = vector.broadcast %cst_20 : f32 to vector<1x256xf32>
    %39 = arith.addf %38, %37 : vector<1x256xf32>
    %40 = arith.divf %38, %39 : vector<1x256xf32>
    %c0_21 = arith.constant 0 : index
    %c0_22 = arith.constant 0 : index
    %41 = vector.load %arg8[%c0_21, %c0_22] : memref<1x256xf32, #tpu.memory_space<vmem>>, vector<1x256xf32>
    tpu.vector_store %arg8[%c0_21, %c0_22], %40 {strides = array<i32>} : memref<1x256xf32, #tpu.memory_space<vmem>>, vector<1x256xf32>,
    return
  }
  func.func @transform_0(%arg0: i32) -> (i32, i32) {
    %c0_i32 = arith.constant 0 : i32
    %c0_i32_0 = arith.constant 0 : i32
    return %c0_i32, %arg0 : i32, i32
  }
  func.func @transform_1(%arg0: i32) -> (i32, i32) {
    %c0_i32 = arith.constant 0 : i32
    %c0_i32_0 = arith.constant 0 : i32
    return %c0_i32, %arg0 : i32, i32
  }
  func.func @transform_2(%arg0: i32) -> (i32, i32) {
    %c0_i32 = arith.constant 0 : i32
    %c0_i32_0 = arith.constant 0 : i32
    %c0_i32_1 = arith.constant 0 : i32
    return %c0_i32, %c0_i32_0 : i32, i32
  }
  func.func @transform_3(%arg0: i32) -> (i32, i32) {
    %c0_i32 = arith.constant 0 : i32
    %c0_i32_0 = arith.constant 0 : i32
    %c0_i32_1 = arith.constant 0 : i32
    return %c0_i32, %c0_i32_0 : i32, i32
  }
  func.func @transform_4(%arg0: i32) -> (i32, i32) {
    %c0_i32 = arith.constant 0 : i32
    %c0_i32_0 = arith.constant 0 : i32
    %c0_i32_1 = arith.constant 0 : i32
    return %c0_i32, %c0_i32_0 : i32, i32
  }
  func.func @transform_5(%arg0: i32) -> (i32, i32) {
    %c0_i32 = arith.constant 0 : i32
    %c0_i32_0 = arith.constant 0 : i32
    %c0_i32_1 = arith.constant 0 : i32
    return %c0_i32, %c0_i32_0 : i32, i32
  }
  func.func @transform_6(%arg0: i32) -> (i32, i32) {
    %c0_i32 = arith.constant 0 : i32
    %c0_i32_0 = arith.constant 0 : i32
    %c0_i32_1 = arith.constant 0 : i32
    return %c0_i32, %c0_i32_0 : i32, i32
  }
  func.func @transform_7(%arg0: i32) -> (i32, i32) {
    %c0_i32 = arith.constant 0 : i32
    %c0_i32_0 = arith.constant 0 : i32
    return %c0_i32, %arg0 : i32, i32
  }
}

</mosaic_0001>

<bundles_post_ra>
// kernel: mlpnet_forward.1
= control target key start
LH: loop header
LB: loop body
LE: loop exit
PB: predicated region body
PF: predicated region fallthrough
CT: control target
= control target key end

     0   :  { %13 = vsyncpa [#allocation4], 0  ;;  %s505_s27 = smov [#allocation3]   ;;  %s506_s29 = smov 128   ;;  %s673_s0 = inlined_call_operand.vmem [shape: s32[1,256], index: 0, kind: input, shape index: {}]   ;;  %s674_s1 = inlined_call_operand.vmem [shape: s32[1,256], index: 1, kind: input, shape index: {}]   ;;  %s675_s2 = inlined_call_operand.vmem [shape: f32[32,32], index: 2, kind: input, shape index: {}]   ;;  %s676_s3 = inlined_call_operand.vmem [shape: f32[32,32], index: 3, kind: input, shape index: {}]   ;;  %s677_s4 = inlined_call_operand.hbm [shape: f32[16,32], index: 4, kind: input, shape index: {}]   ;;  %s678_s5 = inlined_call_operand.vmem [shape: f32[64,1], index: 5, kind: input, shape index: {}]   ;;  %s679_s6 = inlined_call_operand.<no memory space> [shape: f32[1,1], index: 6, kind: input, shape index: {}]   ;;  %s680_s7 = inlined_call_operand.vmem [shape: f32[1,256], index: 7, kind: output, shape index: {}]  }
   0x1   :  { %s26_s26 = sshll.u32 %s677_s4, 4  ;;  %s28_s28 = sshll.u32 %s505_s27, 4  ;;  %s27_s26 = int_to_ptr.hbm [resolvable:$true] %s26_s26  ;;  %s29_s28 = int_to_ptr.vmem [resolvable:$true] %s28_s28 }
   0x2   :  { %s507_s30 = smov 8  }
   0x3   :  { %34 = dma.hbm_to_vmem [thread:$0]  %s27_s26, 256, %s29_s28, [#allocation4], %s506_s29, %s506_s29, %s507_s30  }
   0x4   :  { %503 = dma.done.wait [#allocation4], 256  }
   0x5   :  { %504 = vsyncadd [#allocation4], 4294967040  ;;  %v43_v0 = vlaneseq  ;;  %v48_v3 = vld [vmem:[%s673_s0] sm:$0x3]  ;;  %v508_v12 = vmov 1.0   ;;  %v89_v17 = vld [vmem:[%s675_s2 + $0x18] sm:$0xff] }
   0x6   :  { %v59_v4 = vld [vmem:[%s674_s1] sm:$0x3]  ;;  %v49_v7 = vperm.slane %v48_v3, 0  ;;  %v50_v9 = vperm.slane %v48_v3, 1  ;;  %v87_v18 = vld [vmem:[%s675_s2 + $0x8] sm:$0xff]  ;;  %v88_v19 = vld [vmem:[%s675_s2 + $0x10] sm:$0xff] }
   0x7   :  { %v44_v1 = vshrl.u32 %v43_v0, 7  ;;  %v60_v8 = vperm.slane %v59_v4, 0  ;;  %v61_v10 = vperm.slane %v59_v4, 1  ;;  %v86_v16 = vld [vmem:[%s675_s2] sm:$0xff]  ;;  %v509_v20 = vmov 0   ;;  %v162_v21 = vld [vmem:[%s678_s5 + $0x8] sm:$0xff] }
   0x8   :  { %469 = vset.pattern.permute.xlu1 %v509_v20  ;;  %468 = vset.pattern.permute.xlu0 %v509_v20  ;;  %v161_v24 = vld [vmem:[%s678_s5] sm:$0xff]  ;;  %v164_v25 = vld [vmem:[%s678_s5 + $0x18] sm:$0xff]  ;;  %v163_v30 = vld [vmem:[%s678_s5 + $0x10] sm:$0xff] }
   0x9   :  { %v47_v2 = vadd.s32 24, %v44_v1  ;;  %v46_v5 = vadd.s32 16, %v44_v1  ;;  %v45_v6 = vadd.s32 8, %v44_v1  ;;  %470 = vset.pattern.permute.xlu2 %v509_v20  ;;  %180 = vperm.xlu1 %469, %v162_v21   ;;  %v168_v31 = vld [vmem:[%s678_s5 + $0x38] sm:$0xff]  ;;  %v169_v34 = vld [vmem:[%s676_s3] sm:$0xff]  ;;  %v167_v35 = vld [vmem:[%s678_s5 + $0x30] sm:$0xff] }
   0xa   :  { %190 = vperm.xlu0 %468, %v164_v25   ;;  %v170_v36 = vld [vmem:[%s676_s3 + $0x8] sm:$0xff]  ;;  %v171_v37 = vld [vmem:[%s676_s3 + $0x10] sm:$0xff]  ;;  %v172_v38 = vld [vmem:[%s676_s3 + $0x18] sm:$0xff] }
   0xb   :  { %vm57_vm0 = vcmp.eq.s32.totalorder %v47_v2, %v49_v7  ;;  %vm68_vm1 = vcmp.eq.s32.totalorder %v47_v2, %v60_v8  ;;  %vm58_vm2 = vcmp.eq.s32.totalorder %v47_v2, %v50_v9  ;;  %vm69_vm3 = vcmp.eq.s32.totalorder %v47_v2, %v61_v10  ;;  %v165_v43 = vld [vmem:[%s678_s5 + $0x20] sm:$0xff]  ;;  %v166_v48 = vld [vmem:[%s678_s5 + $0x28] sm:$0xff] }
   0xc   :  { %vm560_vm4 = vmor %vm57_vm0, %vm68_vm1  ;;  %vm55_vm5 = vcmp.eq.s32.totalorder %v46_v5, %v49_v7  ;;  %vm66_vm6 = vcmp.eq.s32.totalorder %v46_v5, %v60_v8  ;;  %vm56_vm7 = vcmp.eq.s32.totalorder %v46_v5, %v50_v9  ;;  %vm67_vm8 = vcmp.eq.s32.totalorder %v46_v5, %v61_v10  ;;  %275 = vperm.xlu2 %470, %v165_v43   ;;  %v271_v5 = vld [vmem:[#allocation3] sm:$0xff] }
   0xd   :  { %425 = vmatpush.msk.msra.mxu0 %vm560_vm4, %v508_v12  ;;  %vm566_vm9 = vmor %vm58_vm2, %vm69_vm3  ;;  %vm53_vm10 = vcmp.eq.s32.totalorder %v45_v6, %v49_v7  ;;  %vm64_vm11 = vcmp.eq.s32.totalorder %v45_v6, %v60_v8  ;;  %vm54_vm13 = vcmp.eq.s32.totalorder %v45_v6, %v50_v9  ;;  %vm65_vm14 = vcmp.eq.s32.totalorder %v45_v6, %v61_v10 }
   0xe   :  { %433 = vmatpush.msk.msra.mxu1 %vm566_vm9, %v508_v12  ;;  %vm572_vm12 = vmor %vm55_vm5, %vm66_vm6  ;;  %vm51_vm0 = vcmp.eq.s32.totalorder %v44_v1, %v49_v7  ;;  %vm62_vm1 = vcmp.eq.s32.totalorder %v44_v1, %v60_v8  ;;  %455 = vmatpush.msk.msra.mxu2 %vm560_vm4, %v508_v12  ;;  %vm52_vm3 = vcmp.eq.s32.totalorder %v44_v1, %v50_v9  ;;  %v272_v7 = vld [vmem:[#allocation3 + $0x8] sm:$0xff] }
   0xf   :  { %426 = vmatpush.msk.msra.mxu0 %vm572_vm12, %v508_v12  ;;  %vm578_vm15 = vmor %vm56_vm7, %vm67_vm8  ;;  %vm63_vm5 = vcmp.eq.s32.totalorder %v44_v1, %v61_v10  ;;  %459 = vmatpush.msk.msra.mxu3 %vm566_vm9, %v508_v12  ;;  %vm90_vm7 = vcmask 261120  }
  0x10   :  { %434 = vmatpush.msk.msra.mxu1 %vm578_vm15, %v508_v12  ;;  %vm72_vm2 = vmor %vm53_vm10, %vm64_vm11  ;;  %456 = vmatpush.msk.msra.mxu2 %vm572_vm12, %v508_v12 }
  0x11   :  { %427 = vmatpush.msk.msra.mxu0 %vm72_vm2, %v508_v12  ;;  %vm73_vm6 = vmor %vm54_vm13, %vm65_vm14  ;;  %460 = vmatpush.msk.msra.mxu3 %vm578_vm15, %v508_v12 }
  0x12   :  { %435 = vmatpush.msk.msra.mxu1 %vm73_vm6, %v508_v12  ;;  %vm70_vm4 = vmor %vm51_vm0, %vm62_vm1  ;;  %457 = vmatpush.msk.msra.mxu2 %vm72_vm2, %v508_v12  ;;  %vm412_vm0 = vcmask 1040384   ;;  %vm417_vm1 = vcmp.lt.s32.totalorder %v43_v0, 256 }
  0x13   :  { %428 = vmatpush.msk.msra.mxu0 %vm70_vm4, %v508_v12  ;;  %vm71_vm8 = vmor %vm52_vm3, %vm63_vm5  ;;  %461 = vmatpush.msk.msra.mxu3 %vm73_vm6, %v508_v12 }
  0x14   :  { %436 = vmatpush.msk.msra.mxu1 %vm71_vm8, %v508_v12  ;;  %429 = vmatmul.msk.f32.vlgmr.msra.gmra.mxu0 %vm90_vm7, %v86_v16 }
  0x15   :  { %437 = vmatmul.msk.f32.vlgmr.msra.gmra.mxu1 %vm90_vm7, %v86_v16  ;;  %458 = vmatpush.msk.msra.mxu2 %vm70_vm4, %v508_v12 }
  0x16   :  { %462 = vmatpush.msk.msra.mxu3 %vm71_vm8, %v508_v12  ;;  %432 = vmatmul.msk.f32.vlgmr.msra.gmra.mxu2 %vm90_vm7, %v89_v17 }
  0x17   :  { %440 = vmatmul.msk.f32.vlgmr.msra.gmra.mxu3 %vm90_vm7, %v89_v17  ;;  %175 = vperm.xlu1 %469, %v161_v24  }
  0x18   :  { %185 = vperm.xlu0 %468, %v163_v30   ;;  %280 = vperm.xlu2 %470, %v166_v48  }
  0x1c   :  { %430 = vmatmul.msk.f32.gmra.mxu0 %vm90_vm7, %v87_v18 }
  0x1d   :  { %438 = vmatmul.msk.f32.gmra.mxu1 %vm90_vm7, %v87_v18 }
  0x1f   :  { %346 = vperm.xlu1 %469, %v168_v31  }
  0x20   :  { %341 = vperm.xlu0 %468, %v167_v35  }
  0x24   :  { %431 = vmatmul.msk.f32.gmra.mxu0 %vm90_vm7, %v88_v19 }
  0x25   :  { %439 = vmatmul.msk.f32.gmra.mxu1 %vm90_vm7, %v88_v19 }
  0x66   :  { %v276_v8 = vpop.permute.xlu2 %275 }
  0x72   :  { %v281_v13 = vpop.permute.xlu2 %280 }
  0x7b   :  { %v181_v46 = vpop.permute.xlu1 %180 }
  0x7c   :  { %v191_v44 = vpop.permute.xlu0 %190 }
  0x89   :  { %v176_v56 = vpop.permute.xlu1 %175 }
  0x8a   :  { %v186_v49 = vpop.permute.xlu0 %185 }
  0x91   :  { %v120_v22 = vpop.f32.mrf.mxu0 }
  0x92   :  { %v149_v23 = vpop.f32.mrf.mxu1  ;;  %v342_v21 = vpop.permute.xlu0 %341 }
  0x99   :  { %v123_v26 = vpop.f32.mrf.mxu0  ;;  %v129_v28 = vpop.f32.mrf.mxu2 }
  0x9a   :  { %v152_v27 = vpop.f32.mrf.mxu1  ;;  %v158_v29 = vpop.f32.mrf.mxu3  ;;  %217 = vmatpush.msrb.mxu2 %v129_v28 }
  0x9b   :  { %246 = vmatpush.msrb.mxu3 %v158_v29 }
  0xa1   :  { %v126_v32 = vpop.f32.mrf.mxu0 }
  0xa2   :  { %v155_v33 = vpop.f32.mrf.mxu1  ;;  %218 = vmatpush.msrb.mxu2 %v126_v32 }
  0xa3   :  { %247 = vmatpush.msrb.mxu3 %v155_v33 }
  0xa4   :  { %219 = vmatpush.msrb.mxu2 %v123_v26 }
  0xa5   :  { %248 = vmatpush.msrb.mxu3 %v152_v27 }
  0xa6   :  { %220 = vmatpush.msrb.mxu2 %v120_v22  ;;  %v347_v22 = vpop.permute.xlu1 %346 }
  0xa7   :  { %249 = vmatpush.msrb.mxu3 %v149_v23  ;;  %441 = vmatmul.msk.f32.vlgmr.msrb.gmra.mxu2 %vm90_vm7, %v169_v34 }
  0xa8   :  { %445 = vmatmul.msk.f32.vlgmr.msrb.gmra.mxu3 %vm90_vm7, %v169_v34 }
  0xaf   :  { %442 = vmatmul.msk.f32.gmra.mxu2 %vm90_vm7, %v170_v36 }
  0xb0   :  { %446 = vmatmul.msk.f32.gmra.mxu3 %vm90_vm7, %v170_v36 }
  0xb7   :  { %443 = vmatmul.msk.f32.gmra.mxu2 %vm90_vm7, %v171_v37 }
  0xb8   :  { %447 = vmatmul.msk.f32.gmra.mxu3 %vm90_vm7, %v171_v37 }
  0xbf   :  { %444 = vmatmul.msk.f32.gmra.mxu2 %vm90_vm7, %v172_v38 }
  0xc0   :  { %448 = vmatmul.msk.f32.gmra.mxu3 %vm90_vm7, %v172_v38 }
 0x12a   :  { %v222_v39 = vpop.f32.mrf.mxu2 }
 0x12b   :  { %v251_v40 = vpop.f32.mrf.mxu3  ;;  %v223_v61 = vadd.f32 %v222_v39, %v176_v56  ;;  %v368_v39 = vstv %s679_s6 }
 0x12c   :  { %v252_v63 = vadd.f32 %v251_v40, %v176_v56 }
 0x12d   :  { %v263_v4 = vmax.f32 %v223_v61, 0.0 }
 0x12e   :  { %v264_v6 = vmax.f32 %v252_v63, 0.0 }
 0x132   :  { %v225_v41 = vpop.f32.mrf.mxu2 }
 0x133   :  { %v254_v42 = vpop.f32.mrf.mxu3  ;;  %v226_v57 = vadd.f32 %v225_v41, %v181_v46 }
 0x134   :  { %v255_v59 = vadd.f32 %v254_v42, %v181_v46 }
 0x135   :  { %v265_v2 = vmax.f32 %v226_v57, 0.0 }
 0x136   :  { %v266_v3 = vmax.f32 %v255_v59, 0.0 }
 0x13a   :  { %v228_v45 = vpop.f32.mrf.mxu2 }
 0x13b   :  { %v257_v47 = vpop.f32.mrf.mxu3  ;;  %v229_v51 = vadd.f32 %v228_v45, %v186_v49 }
 0x13c   :  { %v258_v54 = vadd.f32 %v257_v47, %v186_v49 }
 0x13d   :  { %v267_v62 = vmax.f32 %v229_v51, 0.0 }
 0x13e   :  { %v268_v1 = vmax.f32 %v258_v54, 0.0 }
 0x142   :  { %v231_v50 = vpop.f32.mrf.mxu2 }
 0x143   :  { %v232_v52 = vadd.f32 %v231_v50, %v191_v44  ;;  %v260_v53 = vpop.f32.mrf.mxu3 }
 0x144   :  { %v261_v55 = vadd.f32 %v260_v53, %v191_v44 }
 0x145   :  { %v269_v58 = vmax.f32 %v232_v52, 0.0 }
 0x146   :  { %v270_v60 = vmax.f32 %v261_v55, 0.0 }
 0x147   :  { %301 = vmatpush.msrb.mxu0 %v269_v58 }
 0x148   :  { %324 = vmatpush.msrb.mxu1 %v270_v60 }
 0x149   :  { %302 = vmatpush.msrb.mxu0 %v267_v62 }
 0x14a   :  { %325 = vmatpush.msrb.mxu1 %v268_v1 }
 0x14b   :  { %303 = vmatpush.msrb.mxu0 %v265_v2 }
 0x14c   :  { %326 = vmatpush.msrb.mxu1 %v266_v3 }
 0x14d   :  { %304 = vmatpush.msrb.mxu0 %v263_v4 }
 0x14e   :  { %327 = vmatpush.msrb.mxu1 %v264_v6  ;;  %449 = vmatmul.msk.f32.vlgmr.msrb.gmra.mxu0 %vm90_vm7, %v271_v5 }
 0x14f   :  { %451 = vmatmul.msk.f32.vlgmr.msrb.gmra.mxu1 %vm90_vm7, %v271_v5 }
 0x156   :  { %450 = vmatmul.msk.f32.gmra.mxu0 %vm90_vm7, %v272_v7 }
 0x157   :  { %452 = vmatmul.msk.f32.gmra.mxu1 %vm90_vm7, %v272_v7 }
 0x1cb   :  { %v306_v9 = vpop.f32.mrf.mxu0 }
 0x1cc   :  { %v329_v10 = vpop.f32.mrf.mxu1  ;;  %v307_v11 = vadd.f32 %v306_v9, %v276_v8 }
 0x1cd   :  { %v330_v12 = vadd.f32 %v329_v10, %v276_v8 }
 0x1ce   :  { %v335_v15 = vmax.f32 %v307_v11, 0.0 }
 0x1cf   :  { %v336_v18 = vmax.f32 %v330_v12, 0.0 }
 0x1d0   :  { %v349_v24 = vmul.f32 %v342_v21, %v335_v15 }
 0x1d1   :  { %v350_v26 = vmul.f32 %v342_v21, %v336_v18 }
 0x1d3   :  { %v309_v14 = vpop.f32.mrf.mxu0 }
 0x1d4   :  { %v310_v16 = vadd.f32 %v309_v14, %v281_v13  ;;  %v332_v17 = vpop.f32.mrf.mxu1 }
 0x1d5   :  { %v333_v19 = vadd.f32 %v332_v17, %v281_v13 }
 0x1d6   :  { %v337_v20 = vmax.f32 %v310_v16, 0.0 }
 0x1d7   :  { %v338_v23 = vmax.f32 %v333_v19, 0.0 }
 0x1d8   :  { %v351_v25 = vmul.f32 %v347_v22, %v337_v20 }
 0x1d9   :  { %v352_v27 = vmul.f32 %v347_v22, %v338_v23 }
 0x1da   :  { %v353_v28 = vadd.f32 %v351_v25, %v349_v24 }
 0x1db   :  { %v360_v29 = vadd.f32 %v352_v27, %v350_v26 }
 0x1dc   :  { %v354_v30 = vrot.slane %v353_v28, 4 }
 0x1dd   :  { %v361_v31 = vrot.slane %v360_v29, 4 }
 0x1de   :  { %v355_v32 = vadd.f32 %v354_v30, %v353_v28 }
 0x1df   :  { %v362_v33 = vadd.f32 %v361_v31, %v360_v29 }
 0x1e0   :  { %v356_v34 = vrot.slane %v355_v32, 2 }
 0x1e1   :  { %v363_v35 = vrot.slane %v362_v33, 2 }
 0x1e2   :  { %v357_v36 = vadd.f32 %v356_v34, %v355_v32 }
 0x1e3   :  { %v364_v37 = vadd.f32 %v363_v35, %v362_v33 }
 0x1e4   :  { %v358_v38 = vrot.slane %v357_v36, 1 }
 0x1e5   :  { %v365_v40 = vrot.slane %v364_v37, 1 }
 0x1e6   :  { %v359_v41 = vadd.f32 %v358_v38, %v357_v36 }
 0x1e7   :  { %v366_v42 = vadd.f32 %v365_v40, %v364_v37 }
 0x1e8   :  { %v369_v43 = vadd.f32 %v368_v39, %v359_v41 }
 0x1e9   :  { %v370_v44 = vadd.f32 %v368_v39, %v366_v42 }
 0x1ea   :  { %v453_v45 = vmul.f32 -1.442695, %v369_v43 }
 0x1eb   :  { %v454_v46 = vmul.f32 -1.442695, %v370_v44 }
 0x1ec   :  { %471 = vpow2.f32 %v453_v45 }
 0x1ed   :  { %473 = vpow2.f32 %v454_v46 }
 0x1f2   :  { %v472_v47 = vpop.eup %471 }
 0x1f3   :  { %v474_v48 = vpop.eup %473  ;;  %v377_v49 = vadd.f32 1.0, %v472_v47 }
 0x1f4   :  { %v378_v50 = vadd.f32 1.0, %v474_v48 }
 0x1f5   :  { %475 = vrcp.f32 %v377_v49  ;;  %vm384_vm11 = vweird.f32 %v377_v49  ;;  %v390_v62 = vand.u32 2147483648, %v377_v49  ;;  %v388_v1 = vand.u32 2147483647, %v377_v49 }
 0x1f6   :  { %477 = vrcp.f32 %v378_v50  ;;  %v405_v58 = vand.u32 2147483648, %v378_v50  ;;  %v403_v60 = vand.u32 2147483647, %v378_v50  ;;  %vm399_vm13 = vweird.f32 %v378_v50 }
 0x1f7   :  { %v391_v6 = vor.u32 1.1754944e-38, %v390_v62  ;;  %vm389_vm2 = vcmp.eq.f32.partialorder %v388_v1, 8.507059e+37 }
 0x1f8   :  { %v406_v3 = vor.u32 1.1754944e-38, %v405_v58  ;;  %vm404_vm15 = vcmp.eq.f32.partialorder %v403_v60, 8.507059e+37 }
 0x1fb   :  { %v476_v51 = vpop.eup %475 }
 0x1fc   :  { %v478_v52 = vpop.eup %477  ;;  %v380_v53 = vmul.f32 %v476_v51, %v377_v49  ;;  %vm385_vm9 = vweird.f32 %v476_v51 }
 0x1fd   :  { %v395_v54 = vmul.f32 %v478_v52, %v378_v50  ;;  %vm400_vm10 = vweird.f32 %v478_v52  ;;  %vm663_vm12 = vmor %vm384_vm11, %vm385_vm9 }
 0x1fe   :  { %v381_v55 = vsub.f32 1.0, %v380_v53  ;;  %vm401_vm14 = vmor %vm399_vm13, %vm400_vm10 }
 0x1ff   :  { %v396_v56 = vsub.f32 1.0, %v395_v54 }
 0x200   :  { %v382_v57 = vmul.f32 %v476_v51, %v381_v55 }
 0x201   :  { %v397_v59 = vmul.f32 %v478_v52, %v396_v56 }
 0x202   :  { %v383_v61 = vadd.f32 %v476_v51, %v382_v57 }
 0x203   :  { %v398_v2 = vadd.f32 %v478_v52, %v397_v59 }
 0x204   :  { %v387_v4 = vsel %vm663_vm12, %v476_v51, %v383_v61 }
 0x205   :  { %v402_v5 = vsel %vm401_vm14, %v478_v52, %v398_v2  ;;  %v392_v9 = vsel %vm389_vm2, %v391_v6, %v387_v4 }
 0x206   :  { %v407_v7 = vsel %vm404_vm15, %v406_v3, %v402_v5 }
 0x207   :  { %v411_v8 = vrot.slane %v407_v7, 7 }
 0x209   :  { %v413_v10 = vsel %vm412_vm0, %v392_v9, %v411_v8 }
 0x20a   :  { %419 = vst.msk [vmem:[%s680_s7] sm:$0x3] %vm417_vm1, %v413_v10 }
 0x20b   :  { %424 = vsyncpa [#allocation4], 1 }

</bundles_post_ra>
